<compile_context>
chip_gen: v6e
topology: v6e:2x2x1
jax: 0.10.0
libtpu: 0.0.40
codegen_flags: <defaults>
</compile_context>

<pallas_src>
import jax
import jax.numpy as jnp
from jax.experimental import pallas as pl
from jax.experimental.pallas import tpu as pltpu


def _copy_kernel(src_ref, out_ref):
    # Pure pass-through: ZeroEncoder.forward returns src unchanged.
    out_ref[...] = src_ref[...]


def _pick_lane_dense_cols(n):
    """Largest 'nice' multiple of 128 that divides n, for a lane-dense layout."""
    for c in (4096, 2048, 1024, 512, 256, 128):
        if n % c == 0:
            return c
    return None


def _pick_row_tile(rows, row_bytes, itemsize, target_tile_bytes):
    """Row-tile of ~target_tile_bytes, aligned to packed-sublane granularity,
    chosen so it divides `rows` exactly (or equals the full extent)."""
    sub = max(8, 32 // max(1, itemsize))  # 8 for f32, 16 for bf16, 32 for int8
    tr = max(1, target_tile_bytes // max(1, row_bytes))
    if tr >= rows:
        return rows  # block equals full extent -> always layout-legal
    tr = max(sub, (tr // sub) * sub)
    tr = min(tr, rows)
    # Prefer an exact divisor so every grid step writes a full, unmasked tile.
    while tr > sub and rows % tr != 0:
        tr -= sub
    if rows % tr != 0:
        return rows
    return tr


def zero_encoder_pallas_copy(src, *, target_tile_bytes=2 * 1024 * 1024):
    """Explicit Pallas pass-through (HBM -> VMEM -> HBM) of `src`.

    Only use this when a real materialized copy is required; the semantic hot
    path for ZeroEncoder is `return src` (see `zero_encoder`).
    """
    orig_shape = src.shape
    n = src.size
    itemsize = jnp.dtype(src.dtype).itemsize

    cols = _pick_lane_dense_cols(n)
    if cols is None:
        # Fallback: collapse leading dims, keep the original last dim
        # (may be lane-sparse, but block == full extent so it stays legal).
        cols = orig_shape[-1] if len(orig_shape) >= 1 else 1
        cols = max(1, cols)
    rows = n // cols

    # Metadata-only reshape on a contiguous array: present a lane-dense slab.
    x2d = src.reshape(rows, cols)

    tr = _pick_row_tile(rows, cols * itemsize, itemsize, target_tile_bytes)
    grid = (pl.cdiv(rows, tr),)

    out2d = pl.pallas_call(
        _copy_kernel,
        out_shape=jax.ShapeDtypeStruct((rows, cols), src.dtype),
        grid_spec=pltpu.PrefetchScalarGridSpec(
            num_scalar_prefetch=0,
            grid=grid,
            in_specs=[pl.BlockSpec((tr, cols), lambda i: (i, 0))],
            out_specs=pl.BlockSpec((tr, cols), lambda i: (i, 0)),
        ),
        compiler_params=pltpu.CompilerParams(
            dimension_semantics=("parallel",),
            # 2 MiB tiles, double-buffered in+out = 8 MiB; 32 MiB gives
            # headroom on every generation (<= v7x's 64 MiB physical VMEM).
            vmem_limit_bytes=32 * 1024 * 1024,
        ),
        cost_estimate=pl.CostEstimate(
            flops=0,
            transcendentals=0,
            bytes_accessed=2 * n * itemsize,
        ),
    )(x2d)
    return out2d.reshape(orig_shape)


def zero_encoder(src, mask=None, src_key_padding_mask=None, *, force_copy=False):
    """Identity encoder matching ZeroEncoder.forward.

    mask / src_key_padding_mask are accepted but unused, exactly like the
    PyTorch module.  The default (force_copy=False) path moves zero bytes,
    which is the correct implementation of an identity.  force_copy=True runs
    the explicit Pallas pass-through kernel.
    """
    if force_copy:
        return zero_encoder_pallas_copy(src)
    return src


if __name__ == "__main__":
    key = jax.random.PRNGKey(0)
    k_src, k_mask = jax.random.split(key)

    S, B, H = 8, 2, 32  # seq=8, batch=2, hidden=32
    src = jax.random.normal(k_src, (S, B, H), dtype=jnp.float32)
    mask = jax.random.normal(k_mask, (S, S), dtype=jnp.float32)
    src_key_padding_mask = jnp.zeros((B, S), dtype=jnp.bool_)

    # Recommended hot path: pure identity, zero HBM traffic.
    out_fast = zero_encoder(src, mask, src_key_padding_mask)
    out_fast = jax.block_until_ready(out_fast)

    # Pallas kernel path (explicit lane-dense tiled copy), run once on TPU.
    out_kernel = zero_encoder(src, mask, src_key_padding_mask, force_copy=True)
    out_kernel = jax.block_until_ready(out_kernel)

    assert out_fast.shape == src.shape and out_fast.dtype == src.dtype
    assert out_kernel.shape == src.shape and out_kernel.dtype == src.dtype
    assert bool(jnp.all(out_fast == src))
    assert bool(jnp.all(out_kernel == src))
    print("KERNEL_OK")
</pallas_src>

<mosaic_0001>
module attributes {stable_mosaic.version = 11 : i64} {
  func.func @_copy_kernel(%arg0: i32, %arg1: memref<1x512xf32, #tpu.memory_space<vmem>>, %arg2: memref<1x512xf32, #tpu.memory_space<vmem>>) attributes {dimension_semantics = [#tpu.dimension_semantics<parallel>], iteration_bounds = array<i64: 1>, scalar_prefetch = 0 : i64, scratch_operands = 0 : i64, tpu.core_type = #tpu.core_type<tc>, window_params = [{transform_indices = @transform_0, window_bounds = array<i64: 1, 512>}, {transform_indices = @transform_1, window_bounds = array<i64: 1, 512>}]} {
    %c0 = arith.constant 0 : index
    %c0_0 = arith.constant 0 : index
    %0 = vector.load %arg1[%c0, %c0_0] : memref<1x512xf32, #tpu.memory_space<vmem>>, vector<1x512xf32>
    %c0_1 = arith.constant 0 : index
    %c0_2 = arith.constant 0 : index
    %1 = vector.load %arg2[%c0_1, %c0_2] : memref<1x512xf32, #tpu.memory_space<vmem>>, vector<1x512xf32>
    tpu.vector_store %arg2[%c0_1, %c0_2], %0 {strides = array<i32>} : memref<1x512xf32, #tpu.memory_space<vmem>>, vector<1x512xf32>,
    return
  }
  func.func @transform_0(%arg0: i32) -> (i32, i32) {
    %c0_i32 = arith.constant 0 : i32
    %c0_i32_0 = arith.constant 0 : i32
    return %arg0, %c0_i32 : i32, i32
  }
  func.func @transform_1(%arg0: i32) -> (i32, i32) {
    %c0_i32 = arith.constant 0 : i32
    %c0_i32_0 = arith.constant 0 : i32
    return %arg0, %c0_i32 : i32, i32
  }
}

</mosaic_0001>

<bundles_post_ra>
// kernel: tpu_custom_call.1
= control target key start
LH: loop header
LB: loop body
LE: loop exit
PB: predicated region body
PF: predicated region fallthrough
CT: control target
= control target key end

     0   :  { %6 = vsyncpa [#allocation3], 0  ;;  %s106_s0 = inlined_call_operand.hbm [shape: f32[1,512], index: 0, kind: input, shape index: {}]   ;;  %s107_s1 = inlined_call_operand.hbm [shape: f32[1,512], index: 1, kind: output, shape index: {}]  }
   0x1   :  { %7 = vsyncpa [#allocation4], 0  ;;  %s88_s6 = smov [#allocation2]  }
   0x2   :  { %s14_s7 = sshll.u32 %s88_s6, 4  ;;  %s15_s7 = int_to_ptr.vmem [resolvable:$true] %s14_s7 }
   0x3   :  { %s52_s8 = scalar_lea.vmem %s15_s7, 64  ;;  %p57_p1 = scmp.lt.s32.totalorder %s15_s7, %s15_s7 }
   0x4   :  { %p53_p0 = scmp.ne.s32.totalorder %s15_s7, %s52_s8  ;;  %p58_p2 = scmp.lt.s32.totalorder %s52_s8, %s52_s8 }
   0x6   :  { %p59_p3 = por %p58_p2, %p57_p1 }
   0x8   :  { %p60_p4 = pnand %p59_p3, %p53_p0 }
   0xa   :  { %63 = shalt.err (!%p60_p4)
}
   0xb   :  { %17 = dma.hbm_to_vmem [thread:$0]  %s106_s0, 64, %s15_s7, [#allocation3]  }
   0xc   :  { %84 = dma.done.wait [#allocation3], 64  }
   0xd   :  { %85 = vsyncadd [#allocation3], 4294967232  ;;  %v22_v0 = vlaneseq  ;;  %s89_s11 = smov [#allocation5]   ;;  %v21_v1 = vld [vmem:[#allocation2] sm:$0xf] }
   0xe   :  { %s33_s12 = sshll.u32 %s89_s11, 4  ;;  %s34_s12 = int_to_ptr.vmem [resolvable:$true] %s33_s12 }
   0xf   :  { %vm24_vm0 = vcmp.lt.s32.totalorder %v22_v0, 512  ;;  %s64_s13 = scalar_lea.vmem %s34_s12, 64  ;;  %p69_p6 = scmp.lt.s32.totalorder %s34_s12, %s34_s12 }
  0x10   :  { %26 = vst.msk [vmem:[#allocation5] sm:$0xf] %vm24_vm0, %v21_v1  ;;  %p65_p5 = scmp.ne.s32.totalorder %s34_s12, %s64_s13  ;;  %p70_p7 = scmp.lt.s32.totalorder %s64_s13, %s64_s13 }
  0x12   :  { %p71_p8 = por %p70_p7, %p69_p6 }
  0x14   :  { %p72_p9 = pnand %p71_p8, %p65_p5 }
  0x16   :  { %75 = shalt.err (!%p72_p9)
}
  0x17   :  { %36 = dma.vmem_to_hbm [thread:$0]  %s34_s12, 64, %s107_s1, [#allocation4]  }
  0x18   :  { %86 = dma.done.wait [#allocation4], 64  }
  0x19   :  { %87 = vsyncadd [#allocation4], 4294967232 }
  0x1a   :  { %40 = vsyncpa [#allocation3], 1 }
  0x1b   :  { %41 = vsyncpa [#allocation4], 1 }

</bundles_post_ra>
